<compile_context>
chip_gen: v7x
topology: tpu7x:2x2x1
jax: 0.10.0
libtpu: 0.0.40
codegen_flags: <defaults>
</compile_context>

<pallas_src>
import jax
import jax.numpy as jnp
from jax.experimental import pallas as pl
from jax.experimental.pallas import tpu as pltpu


def _conv1x1_kernel(x_ref, w_ref, b_ref, o_ref):
    """x_ref: (C, P) VMEM; w_ref: (O, C) VMEM; b_ref: (O, 1) VMEM; o_ref: (O, P) VMEM.

    Computes o = W @ x + b as C broadcasted FMAs on the VPU and issues a single
    lane-dense store of the whole (O, P) slab.
    """
    C = x_ref.shape[0]
    x = x_ref[...]                                   # (C, P) f32
    w = w_ref[...]                                   # (O, C) f32

    # C == 3: fully unrolled broadcasted outer-product FMAs: (O,1) * (1,P).
    acc = w[:, 0:1] * x[0:1, :]
    for c in range(1, C):
        acc = acc + w[:, c:c + 1] * x[c:c + 1, :]

    # Single unmasked store (bias broadcast over lanes folded into the store value).
    o_ref[...] = (acc + b_ref[...]).astype(o_ref.dtype)


def conv1x1_pad1(x_nchw, weight, bias_eff, block_pixels=None):
    """Equivalent to Conv2d(C, O, 1, stride=1, padding=1)(x) with bias `bias_eff`.

    x_nchw: (N, C, H, W) f32; weight: (O, C) f32; bias_eff: (O,) f32.
    Returns (N, O, H+2, W+2) f32.

    block_pixels: optional tile size (multiple of 128) along the flattened
    pixel axis; inputs with P <= block_pixels use a single grid-less call.
    """
    N, C, H, W = x_nchw.shape
    O = weight.shape[0]
    P = N * H * W

    x = x_nchw.astype(jnp.float32)
    # Wrapper-side layout plumbing (cheap XLA ops): channels-first, flattened
    # lane-dense pixel axis.  Doing this in-kernel would materialize VMEM copies.
    x_flat = jnp.transpose(x, (1, 0, 2, 3)).reshape(C, P)
    w = weight.astype(jnp.float32)
    b2 = bias_eff.astype(jnp.float32).reshape(O, 1)

    if block_pixels is None:
        block_pixels = 16384                       # whole-array path up to ~0.75 MB of output
    assert block_pixels % 128 == 0, "block_pixels must be a multiple of 128"

    if P <= block_pixels:
        # Tiny working set: one invocation, everything resident in VMEM.
        y = pl.pallas_call(
            _conv1x1_kernel,
            out_shape=jax.ShapeDtypeStruct((O, P), jnp.float32),
            in_specs=[
                pl.BlockSpec(memory_space=pltpu.MemorySpace.VMEM),   # x_flat
                pl.BlockSpec(memory_space=pltpu.MemorySpace.VMEM),   # weight
                pl.BlockSpec(memory_space=pltpu.MemorySpace.VMEM),   # bias(+other)
            ],
            out_specs=pl.BlockSpec(memory_space=pltpu.MemorySpace.VMEM),
        )(x_flat, w, b2)
    else:
        # Large inputs: pipeline over the pixel axis; "parallel" axis lets the
        # 2 TensorCores on v7x split the grid.
        TP = block_pixels
        n_blk = pl.cdiv(P, TP)
        P_pad = n_blk * TP
        if P_pad != P:
            x_flat = jnp.pad(x_flat, ((0, 0), (0, P_pad - P)))
        y = pl.pallas_call(
            _conv1x1_kernel,
            out_shape=jax.ShapeDtypeStruct((O, P_pad), jnp.float32),
            grid=(n_blk,),
            in_specs=[
                pl.BlockSpec((C, TP), lambda i: (0, i)),   # x block (lane-dense)
                pl.BlockSpec((O, C), lambda i: (0, 0)),    # weights (resident)
                pl.BlockSpec((O, 1), lambda i: (0, 0)),    # bias (resident)
            ],
            out_specs=pl.BlockSpec((O, TP), lambda i: (0, i)),
            compiler_params=pltpu.CompilerParams(
                dimension_semantics=("parallel",)),
        )(x_flat, w, b2)
        y = y[:, :P]

    # Back to NCHW and add the 1-pixel border implied by padding=1 on a 1x1
    # conv: border value is exactly bias (+ folded scalar `other`).
    y4 = y.reshape(O, N, H, W).transpose(1, 0, 2, 3)           # (N, O, H, W)
    Hp, Wp = H + 2, W + 2
    out = jnp.broadcast_to(b2.reshape(1, O, 1, 1), (N, O, Hp, Wp))
    out = out.at[:, :, 1:Hp - 1, 1:Wp - 1].set(y4)
    return out


class Model:
    """JAX/Pallas port of the PyTorch Model (Conv2d(3, 8, 1, padding=1) + other)."""

    def __init__(self, key):
        kw, kb = jax.random.split(key)
        C_in, C_out, k = 3, 8, 1
        # PyTorch-style uniform init, bound = 1/sqrt(fan_in)
        bound = 1.0 / (C_in * k * k) ** 0.5
        self.weight = jax.random.uniform(
            kw, (C_out, C_in), minval=-bound, maxval=bound, dtype=jnp.float32)
        self.bias = jax.random.uniform(
            kb, (C_out,), minval=-bound, maxval=bound, dtype=jnp.float32)

    def forward(self, x1, other=0.0, padding1=1):
        # NOTE: the original module draws torch.randn(v1.shape) into a local
        # named `padding1` that is never used; it does not affect the output,
        # so it is intentionally omitted (dead code).
        if jnp.ndim(other) == 0:
            # Fold the scalar `other` into the bias once (free, in the wrapper).
            b_eff = self.bias + jnp.asarray(other, dtype=jnp.float32)
            return conv1x1_pad1(x1, self.weight, b_eff)
        # Tensor-valued `other`: broadcast-add outside the kernel.
        return conv1x1_pad1(x1, self.weight, self.bias) + jnp.asarray(
            other, dtype=jnp.float32)


if __name__ == "__main__":
    key = jax.random.PRNGKey(0)
    k_model, k_x = jax.random.split(key)

    model = Model(k_model)

    # Small shapes consistent with the module: batch=2, C_in=3 (fixed by the
    # conv), spatial=16.
    x1 = jax.random.normal(k_x, (2, 3, 16, 16), dtype=jnp.float32)

    # Main (grid-less, lane-dense) path.
    out = jax.block_until_ready(model.forward(x1, other=0.0))
    assert out.shape == (2, 8, 18, 18), out.shape

    ref = (jnp.einsum("oc,nchw->nohw",
                      model.weight,
                      jnp.pad(x1, ((0, 0), (0, 0), (1, 1), (1, 1))))
           + model.bias[None, :, None, None])
    assert jnp.allclose(out, ref, atol=1e-5, rtol=1e-5)

    # Also exercise the gridded / pipelined "parallel" path (used for large
    # inputs) by forcing a small pixel block on the same data.
    out_grid = jax.block_until_ready(
        conv1x1_pad1(x1, model.weight, model.bias, block_pixels=128))
    assert jnp.allclose(out_grid, ref, atol=1e-5, rtol=1e-5)

    print("KERNEL_OK")
</pallas_src>

<mosaic_0001>
module attributes {stable_mosaic.version = 11 : i64} {
  func.func @_conv1x1_kernel(%arg0: memref<3x512xf32, #tpu.memory_space<vmem>>, %arg1: memref<8x3xf32, #tpu.memory_space<vmem>>, %arg2: memref<8x1xf32, #tpu.memory_space<vmem>>, %arg3: memref<8x512xf32, #tpu.memory_space<vmem>>) attributes {dimension_semantics = [], scalar_prefetch = 0 : i64, scratch_operands = 0 : i64, tpu.core_type = #tpu.core_type<tc>} {
    %c0 = arith.constant 0 : index
    %c0_0 = arith.constant 0 : index
    %0 = vector.load %arg0[%c0, %c0_0] : memref<3x512xf32, #tpu.memory_space<vmem>>, vector<3x512xf32>
    %c0_1 = arith.constant 0 : index
    %c0_2 = arith.constant 0 : index
    %1 = vector.load %arg1[%c0_1, %c0_2] : memref<8x3xf32, #tpu.memory_space<vmem>>, vector<8x3xf32>
    %2 = vector.extract_strided_slice %1 {offsets = [0, 0], sizes = [8, 1], strides = [1, 1]} : vector<8x3xf32> to vector<8x1xf32>
    %3 = vector.extract_strided_slice %0 {offsets = [0, 0], sizes = [1, 512], strides = [1, 1]} : vector<3x512xf32> to vector<1x512xf32>
    %4 = vector.broadcast %2 : vector<8x1xf32> to vector<8x512xf32>
    %5 = vector.broadcast %3 : vector<1x512xf32> to vector<8x512xf32>
    %6 = arith.mulf %4, %5 : vector<8x512xf32>
    %7 = vector.extract_strided_slice %1 {offsets = [0, 1], sizes = [8, 1], strides = [1, 1]} : vector<8x3xf32> to vector<8x1xf32>
    %8 = vector.extract_strided_slice %0 {offsets = [1, 0], sizes = [1, 512], strides = [1, 1]} : vector<3x512xf32> to vector<1x512xf32>
    %9 = vector.broadcast %7 : vector<8x1xf32> to vector<8x512xf32>
    %10 = vector.broadcast %8 : vector<1x512xf32> to vector<8x512xf32>
    %11 = arith.mulf %9, %10 : vector<8x512xf32>
    %12 = arith.addf %6, %11 : vector<8x512xf32>
    %13 = vector.extract_strided_slice %1 {offsets = [0, 2], sizes = [8, 1], strides = [1, 1]} : vector<8x3xf32> to vector<8x1xf32>
    %14 = vector.extract_strided_slice %0 {offsets = [2, 0], sizes = [1, 512], strides = [1, 1]} : vector<3x512xf32> to vector<1x512xf32>
    %15 = vector.broadcast %13 : vector<8x1xf32> to vector<8x512xf32>
    %16 = vector.broadcast %14 : vector<1x512xf32> to vector<8x512xf32>
    %17 = arith.mulf %15, %16 : vector<8x512xf32>
    %18 = arith.addf %12, %17 : vector<8x512xf32>
    %c0_3 = arith.constant 0 : index
    %c0_4 = arith.constant 0 : index
    %19 = vector.load %arg2[%c0_3, %c0_4] : memref<8x1xf32, #tpu.memory_space<vmem>>, vector<8x1xf32>
    %20 = vector.broadcast %19 : vector<8x1xf32> to vector<8x512xf32>
    %21 = arith.addf %18, %20 : vector<8x512xf32>
    %c0_5 = arith.constant 0 : index
    %c0_6 = arith.constant 0 : index
    %22 = vector.load %arg3[%c0_5, %c0_6] : memref<8x512xf32, #tpu.memory_space<vmem>>, vector<8x512xf32>
    tpu.vector_store %arg3[%c0_5, %c0_6], %21 {strides = array<i32>} : memref<8x512xf32, #tpu.memory_space<vmem>>, vector<8x512xf32>,
    return
  }
}

</mosaic_0001>

<bundles_post_ra>
// kernel: tpu_custom_call.1
= control target key start
LH: loop header
LB: loop body
LE: loop exit
PB: predicated region body
PF: predicated region fallthrough
CT: control target
= control target key end

     0   :  { %v222_v1 = vmov 0   ;;  %v223_v2 = vmov 2   ;;  %s270_s0 = inlined_call_operand.vmem [shape: f32[3,512], index: 0, kind: input, shape index: {}]   ;;  %s271_s1 = inlined_call_operand.vmem [shape: f32[8,3], index: 1, kind: input, shape index: {}]   ;;  %s272_s2 = inlined_call_operand.vmem [shape: f32[8,1], index: 2, kind: input, shape index: {}]   ;;  %s273_s3 = inlined_call_operand.hbm [shape: f32[8,512], index: 3, kind: output, shape index: {}]  }
   0x1   :  { %v17_v0 = vld [vmem:[%s271_s1] sm:$0xff]  ;;  %193 = vset.pattern.permute.xlu0 %v222_v1  ;;  %195 = vset.pattern.permute.xlu1 %v223_v2 }
   0x2   :  { %8 = vsyncpa [#allocation3], 0  ;;  %20 = vperm.xlu0 %193, %v17_v0   ;;  %114 = vperm.xlu1 %195, %v17_v0   ;;  %v161_v3 = vld [vmem:[%s272_s2] sm:$0xff]  ;;  %v224_v4 = vmov 1   ;;  %v25_v5 = vlaneseq  ;;  %v16_v10 = vld [vmem:[%s270_s0 + $0x8] sm:$0x77] }
   0x3   :  { %v15_v9 = vld [vmem:[%s270_s0] sm:$0x77]  ;;  %s225_s0 = smov [#allocation2]  }
   0x4   :  { %v26_v6 = vshrl.u32 %v25_v5, 7  ;;  %s181_s2 = sshll.u32 %s225_s0, 4  ;;  %s182_s2 = int_to_ptr.vmem [resolvable:$true] %s181_s2 }
   0x5   :  { %s198_s19 = scalar_lea.vmem %s182_s2, 512  ;;  %p203_p1 = scmp.lt.s32.totalorder %s182_s2, %s182_s2 }
   0x6   :  { %194 = vset.pattern.permute.xlu0 %v224_v4  ;;  %196 = vset.pattern.permute.xlu1 %v222_v1  ;;  %v27_v7 = vsub.s32 0, %v26_v6  ;;  %v31_v8 = vsub.s32 4, %v26_v6  ;;  %v119_v11 = vsub.s32 2, %v26_v6  ;;  %v123_v12 = vsub.s32 6, %v26_v6  ;;  %p199_p0 = scmp.ne.s32.totalorder %s182_s2, %s198_s19  ;;  %p204_p2 = scmp.lt.s32.totalorder %s198_s19, %s198_s19 }
   0x7   :  { %66 = vperm.xlu0 %194, %v17_v0   ;;  %164 = vperm.xlu1 %196, %v161_v3   ;;  %v71_v13 = vsub.s32 1, %v26_v6  ;;  %v75_v14 = vsub.s32 5, %v26_v6 }
   0x8   :  { %v28_v15 = vrot.slane %v15_v9, %v27_v7  ;;  %v32_v16 = vrot.slane %v15_v9, %v31_v8  ;;  %v36_v17 = vrot.slane %v16_v10, %v27_v7  ;;  %v40_v18 = vrot.slane %v16_v10, %v31_v8  ;;  %p205_p3 = por %p204_p2, %p203_p1 }
   0x9   :  { %v120_v19 = vrot.slane %v15_v9, %v119_v11  ;;  %v124_v20 = vrot.slane %v15_v9, %v123_v12  ;;  %v128_v21 = vrot.slane %v16_v10, %v119_v11  ;;  %v132_v22 = vrot.slane %v16_v10, %v123_v12 }
   0xa   :  { %v72_v23 = vrot.slane %v15_v9, %v71_v13  ;;  %v76_v24 = vrot.slane %v15_v9, %v75_v14  ;;  %v80_v25 = vrot.slane %v16_v10, %v71_v13  ;;  %v84_v26 = vrot.slane %v16_v10, %v75_v14  ;;  %p206_p4 = pnand %p205_p3, %p199_p0 }
   0xb   :  { %197 = vset.pattern.permute.xlu0 %v222_v1  ;;  %v48_v28 = vrot.slane %v28_v15, %v27_v7  ;;  %v52_v29 = vrot.slane %v32_v16, %v27_v7  ;;  %v56_v30 = vrot.slane %v36_v17, %v27_v7  ;;  %v60_v31 = vrot.slane %v40_v18, %v27_v7 }
   0xc   :  { %v140_v32 = vrot.slane %v120_v19, %v119_v11  ;;  %v144_v33 = vrot.slane %v124_v20, %v119_v11  ;;  %v148_v34 = vrot.slane %v128_v21, %v119_v11  ;;  %v152_v35 = vrot.slane %v132_v22, %v119_v11 }
   0xd   :  { %v92_v36 = vrot.slane %v72_v23, %v71_v13  ;;  %v96_v37 = vrot.slane %v76_v24, %v71_v13  ;;  %v100_v38 = vrot.slane %v80_v25, %v71_v13  ;;  %v104_v39 = vrot.slane %v84_v26, %v71_v13 }
  0x81   :  { %v21_v27 = vpop.permute.xlu0 %20  ;;  %v115_v40 = vpop.permute.xlu1 %114 }
  0x82   :  { %v61_v41 = vmul.f32 %v48_v28, %v21_v27  ;;  %v62_v42 = vmul.f32 %v52_v29, %v21_v27  ;;  %v63_v43 = vmul.f32 %v56_v30, %v21_v27  ;;  %v64_v44 = vmul.f32 %v60_v31, %v21_v27 }
  0x83   :  { %v153_v46 = vmul.f32 %v140_v32, %v115_v40  ;;  %v154_v47 = vmul.f32 %v144_v33, %v115_v40  ;;  %v155_v48 = vmul.f32 %v148_v34, %v115_v40  ;;  %v156_v49 = vmul.f32 %v152_v35, %v115_v40 }
  0x86   :  { %v67_v45 = vpop.permute.xlu0 %66  ;;  %v165_v58 = vpop.permute.xlu1 %164 }
  0x87   :  { %v105_v50 = vmul.f32 %v92_v36, %v67_v45  ;;  %v106_v51 = vmul.f32 %v96_v37, %v67_v45  ;;  %v107_v52 = vmul.f32 %v100_v38, %v67_v45  ;;  %v108_v53 = vmul.f32 %v104_v39, %v67_v45 }
  0x89   :  { %v109_v54 = vadd.f32 %v105_v50, %v61_v41  ;;  %v110_v55 = vadd.f32 %v106_v51, %v62_v42  ;;  %v111_v56 = vadd.f32 %v107_v52, %v63_v43  ;;  %v112_v57 = vadd.f32 %v108_v53, %v64_v44 }
  0x8b   :  { %v157_v59 = vadd.f32 %v153_v46, %v109_v54  ;;  %v158_v60 = vadd.f32 %v154_v47, %v110_v55  ;;  %v159_v61 = vadd.f32 %v155_v48, %v111_v56  ;;  %v160_v62 = vadd.f32 %v156_v49, %v112_v57 }
  0x8d   :  { %v167_v63 = vadd.f32 %v165_v58, %v157_v59  ;;  %v168_v0 = vadd.f32 %v165_v58, %v158_v60  ;;  %v169_v1 = vadd.f32 %v165_v58, %v159_v61  ;;  %v170_v2 = vadd.f32 %v165_v58, %v160_v62 }
  0x8f   :  { %171 = vst [vmem:[#allocation2] sm:$0xff] %v167_v63  ;;  %172 = vst [vmem:[#allocation2 + $0x8] sm:$0xff] %v168_v0 }
  0x90   :  { %173 = vst [vmem:[#allocation2 + $0x10] sm:$0xff] %v169_v1  ;;  %174 = vst [vmem:[#allocation2 + $0x18] sm:$0xff] %v170_v2 }
  0x91   :  { %209 = shalt.err (!%p206_p4)
}
  0x92   :  { %s210_s22 = scalar_lea.hbm %s273_s3, 512 }
  0x93   :  { %p211_p5 = scmp.ne.s32.totalorder %s273_s3, %s210_s22  ;;  %p214_p6 = scmp.lt.u32.totalorder %s210_s22, %s273_s3 }
  0x95   :  { %p216_p7 = pnand %p214_p6, %p211_p5 }
  0x97   :  { %219 = shalt.err (!%p216_p7)
}
  0x98   :  { %184 = dma.vmem_to_hbm [thread:$0]  %s182_s2, 512, %s273_s3, [#allocation3]  }
  0x99   :  { %220 = dma.done.wait [#allocation3], 512  }
  0x9a   :  { %221 = vsyncadd [#allocation3], 4294966784 }
  0x9b   :  { %188 = vsyncpa [#allocation3], 1 }

</bundles_post_ra>
